<compile_context>
chip_gen: v5e
topology: v5e:2x2
jax: 0.10.0
libtpu: 0.0.40
codegen_flags: <defaults>
</compile_context>

<pallas_src>
import jax
import jax.numpy as jnp
from jax.experimental import pallas as pl
from jax.experimental.pallas import tpu as pltpu


# ~2 MiB per streamed block keeps 4 double-buffered blocks (~8 MiB) inside the
# scoped-VMEM default of every TPU generation (incl. v7x's smaller VMEM) while
# being large enough to amortize the ~0.35 us per-grid-step overhead.
_TARGET_BLOCK_BYTES = 2 * 1024 * 1024


def _droppath_kernel(scale_ref, x_ref, o_ref):
    # scale_ref: (tr, 1) per-row scale (0 or 1/keep_prob), f32.
    # x_ref/o_ref: (tr, td) lane-dense tile of the flattened activation.
    # Multiply in f32 (matches x / keep_prob to within rounding of the
    # division itself), then cast back -- free for a mem-bound op.
    o_ref[...] = (x_ref[...].astype(jnp.float32) * scale_ref[...]).astype(o_ref.dtype)


def _round_up(n: int, m: int) -> int:
    return ((n + m - 1) // m) * m


def _choose_tiles(rows: int, d_eff: int, itemsize: int):
    """Pick (row_tile, lane_tile) targeting ~_TARGET_BLOCK_BYTES per block."""
    if rows * d_eff * itemsize <= _TARGET_BLOCK_BYTES:
        return rows, d_eff  # whole slab fits in one block

    # Prefer full rows + a wide lane tile (multiple of 128).
    max_td = max(128, (_TARGET_BLOCK_BYTES // (rows * itemsize)) // 128 * 128)
    if max_td >= 512 or rows < 16:
        td = min(max_td, _round_up(d_eff, 128))
        return rows, td

    # rows is large: tile rows too, keep the lane tile wide and lane-dense.
    td = min(_round_up(d_eff, 128), 16384)
    tr = max(8, (_TARGET_BLOCK_BYTES // (td * itemsize)) // 8 * 8)
    tr = min(tr, rows)
    return tr, td


def drop_path(x, drop_prob: float, seed: int, training: bool = True):
    """JAX/Pallas equivalent of DropPath.forward."""
    if drop_prob == 0.0 or not training:
        return x

    keep_prob = 1.0 - drop_prob
    b = x.shape[0]
    d = x.size // b
    itemsize = jnp.dtype(x.dtype).itemsize

    # One uniform draw per batch element -> {0, 1/keep_prob} per-sample scale.
    # Kept in f32 so the effective division matches the reference precision.
    u = jax.random.uniform(jax.random.PRNGKey(seed), (b, 1), dtype=jnp.float32)
    binary_mask = jnp.floor(keep_prob + u)                    # (b, 1) in {0, 1}
    scale = binary_mask * jnp.float32(1.0 / keep_prob)        # (b, 1) f32

    # Fill sublanes for small batches: (b, d) -> (b*fold, d/fold).
    # Target rows: 8 for 4-byte dtypes, 16 for 2-byte, 32 for 1-byte.
    sublane_rows = 8 * max(1, 4 // itemsize)
    fold = 1
    if b < sublane_rows:
        f = max(1, sublane_rows // b)
        while f > 1 and d % f != 0:
            f -= 1
        fold = f
    rows = b * fold
    d_eff = d // fold
    x2 = x.reshape(rows, d_eff)
    if fold > 1:
        scale = jnp.repeat(scale, fold, axis=0)               # (rows, 1)

    # Tile selection + cdiv grid (ragged last blocks are masked by Pallas --
    # no wrapper-side pad / slice, so HBM traffic is exactly 1 read + 1 write).
    tr, td = _choose_tiles(rows, d_eff, itemsize)
    grid = (pl.cdiv(rows, tr), pl.cdiv(d_eff, td))

    out2 = pl.pallas_call(
        _droppath_kernel,
        out_shape=jax.ShapeDtypeStruct((rows, d_eff), x2.dtype),
        grid=grid,
        in_specs=[
            pl.BlockSpec((tr, 1), lambda i, j: (i, 0)),       # per-row scale
            pl.BlockSpec((tr, td), lambda i, j: (i, j)),      # streamed x tile
        ],
        out_specs=pl.BlockSpec((tr, td), lambda i, j: (i, j)),
        compiler_params=pltpu.CompilerParams(
            dimension_semantics=("parallel", "parallel"),
            vmem_limit_bytes=32 * 1024 * 1024,
        ),
        cost_estimate=pl.CostEstimate(
            flops=rows * d_eff,
            transcendentals=0,
            bytes_accessed=2 * rows * d_eff * itemsize + rows * 4),
    )(scale, x2)

    return out2.reshape(x.shape)


if __name__ == "__main__":
    key = jax.random.PRNGKey(0)
    B, C, H, W = 2, 4, 16, 16
    x = jax.random.normal(key, (B, C, H, W), dtype=jnp.float32)

    drop_prob = 0.3
    keep_prob = 1.0 - drop_prob

    # Training path (stochastic): each sample is either zeroed or scaled by
    # 1/keep_prob; the scale is constant across all non-batch dims.
    y = jax.block_until_ready(drop_path(x, drop_prob=drop_prob, seed=1234,
                                        training=True))

    ok = True
    for i in range(B):
        yi = y[i]
        is_zero = bool(jnp.all(yi == 0))
        is_kept = bool(jnp.allclose(yi, x[i] / keep_prob, rtol=1e-5, atol=1e-5))
        if not (is_zero or is_kept):
            ok = False

    # Eval path (identity).
    y_eval = jax.block_until_ready(drop_path(x, drop_prob=drop_prob, seed=1234,
                                             training=False))
    if not bool(jnp.allclose(y_eval, x)):
        ok = False

    print("KERNEL_OK" if ok else "KERNEL_MISMATCH")
</pallas_src>

<mosaic_0001>
module attributes {stable_mosaic.version = 11 : i64} {
  func.func @_droppath_kernel(%arg0: i32, %arg1: i32, %arg2: memref<8x1xf32, #tpu.memory_space<vmem>>, %arg3: memref<8x256xf32, #tpu.memory_space<vmem>>, %arg4: memref<8x256xf32, #tpu.memory_space<vmem>>) attributes {dimension_semantics = [#tpu.dimension_semantics<parallel>, #tpu.dimension_semantics<parallel>], iteration_bounds = array<i64: 1, 1>, scalar_prefetch = 0 : i64, scratch_operands = 0 : i64, tpu.core_type = #tpu.core_type<tc>, window_params = [{transform_indices = @transform_0, window_bounds = array<i64: 8, 1>}, {transform_indices = @transform_1, window_bounds = array<i64: 8, 256>}, {transform_indices = @transform_2, window_bounds = array<i64: 8, 256>}]} {
    %c0 = arith.constant 0 : index
    %c0_0 = arith.constant 0 : index
    %0 = vector.load %arg3[%c0, %c0_0] : memref<8x256xf32, #tpu.memory_space<vmem>>, vector<8x256xf32>
    %c0_1 = arith.constant 0 : index
    %c0_2 = arith.constant 0 : index
    %1 = vector.load %arg2[%c0_1, %c0_2] : memref<8x1xf32, #tpu.memory_space<vmem>>, vector<8x1xf32>
    %2 = vector.broadcast %1 : vector<8x1xf32> to vector<8x256xf32>
    %3 = arith.mulf %0, %2 : vector<8x256xf32>
    %c0_3 = arith.constant 0 : index
    %c0_4 = arith.constant 0 : index
    %4 = vector.load %arg4[%c0_3, %c0_4] : memref<8x256xf32, #tpu.memory_space<vmem>>, vector<8x256xf32>
    tpu.vector_store %arg4[%c0_3, %c0_4], %3 {strides = array<i32>} : memref<8x256xf32, #tpu.memory_space<vmem>>, vector<8x256xf32>,
    return
  }
  func.func @transform_0(%arg0: i32, %arg1: i32) -> (i32, i32) {
    %c0_i32 = arith.constant 0 : i32
    %c0_i32_0 = arith.constant 0 : i32
    return %arg0, %c0_i32 : i32, i32
  }
  func.func @transform_1(%arg0: i32, %arg1: i32) -> (i32, i32) {
    %c0_i32 = arith.constant 0 : i32
    return %arg0, %arg1 : i32, i32
  }
  func.func @transform_2(%arg0: i32, %arg1: i32) -> (i32, i32) {
    %c0_i32 = arith.constant 0 : i32
    return %arg0, %arg1 : i32, i32
  }
}

</mosaic_0001>

<bundles_post_ra>
// kernel: tpu_custom_call.1
= control target key start
LH: loop header
LB: loop body
LE: loop exit
PB: predicated region body
PF: predicated region fallthrough
CT: control target
= control target key end

     0   :  { %7 = vsyncpa [#allocation3], 0  ;;  %s138_s0 = inlined_call_operand.vmem [shape: f32[8,1], index: 0, kind: input, shape index: {}]   ;;  %s139_s1 = inlined_call_operand.hbm [shape: f32[8,256], index: 1, kind: input, shape index: {}]   ;;  %s140_s2 = inlined_call_operand.hbm [shape: f32[8,256], index: 2, kind: output, shape index: {}]  }
   0x1   :  { %8 = vsyncpa [#allocation4], 0  ;;  %s16_s11 = sshll.u32 %s139_s1, 4  ;;  %s111_s12 = smov [#allocation2]   ;;  %s17_s11 = int_to_ptr.hbm [resolvable:$true] %s16_s11 }
   0x2   :  { %s18_s13 = sshll.u32 %s111_s12, 4  ;;  %s19_s13 = int_to_ptr.vmem [resolvable:$true] %s18_s13 }
   0x3   :  { %21 = dma.hbm_to_vmem [thread:$0]  %s17_s11, 256, %s19_s13, [#allocation3]  }
   0x4   :  { %107 = dma.done.wait [#allocation3], 256  }
   0x5   :  { %108 = vsyncadd [#allocation3], 4294967040  ;;  %v112_v0 = vmov 0   ;;  %v28_v1 = vld [vmem:[%s138_s0] sm:$0xff]  ;;  %v27_v3 = vld [vmem:[#allocation2 + $0x8] sm:$0xff]  ;;  %s113_s16 = smov [#allocation5]  }
   0x6   :  { %58 = vset.pattern.permute.xlu0 %v112_v0  ;;  %v26_v2 = vld [vmem:[#allocation2] sm:$0xff]  ;;  %s43_s17 = sshll.u32 %s113_s16, 4  ;;  %s45_s19 = sshll.u32 %s140_s2, 4  ;;  %s44_s17 = int_to_ptr.vmem [resolvable:$true] %s43_s17  ;;  %s46_s19 = int_to_ptr.hbm [resolvable:$true] %s45_s19 }
   0x7   :  { %31 = vperm.xlu0 %58, %v28_v1  }
  0x79   :  { %v32_v4 = vpop.permute.xlu0 %31 }
  0x7a   :  { %v34_v5 = vmul.f32 %v32_v4, %v26_v2  ;;  %v35_v6 = vmul.f32 %v32_v4, %v27_v3 }
  0x7c   :  { %36 = vst [vmem:[#allocation5] sm:$0xff] %v34_v5 }
  0x7d   :  { %37 = vst [vmem:[#allocation5 + $0x8] sm:$0xff] %v35_v6 }
  0x7e   :  { %48 = dma.vmem_to_hbm [thread:$0]  %s44_s17, 256, %s46_s19, [#allocation4]  }
  0x7f   :  { %109 = dma.done.wait [#allocation4], 256  }
  0x80   :  { %110 = vsyncadd [#allocation4], 4294967040 }
  0x81   :  { %53 = vsyncpa [#allocation3], 1 }
  0x82   :  { %54 = vsyncpa [#allocation4], 1 }

</bundles_post_ra>
